<compile_context>
chip_gen: v6e
topology: v6e:2x2x1
jax: 0.10.0
libtpu: 0.0.40
codegen_flags: <defaults>
</compile_context>

<pallas_src>
import functools

import jax
import jax.numpy as jnp
from jax.experimental import pallas as pl
from jax.experimental.pallas import tpu as pltpu

BN_EPS = 1e-5


def _mini_pointnet_kernel(x_ref, w1_ref, b1_ref, w2_ref, b2_ref, o_ref, *, chunk):
    # x_ref: (tile, c_in) point tile in its native layout.
    # o_ref: (num_classes, tile) channels-first output tile (points on lanes).
    w1 = w1_ref[...]            # (hidden, c_in)      -- BN already folded in
    b1 = b1_ref[...]            # (hidden, 1)
    w2 = w2_ref[...]            # (num_classes, hidden)
    b2 = b2_ref[...]            # (num_classes, 1)

    tile = x_ref.shape[0]
    n_chunks = tile // chunk

    # Static (fully unrolled) chunk loop — bounds the (hidden, chunk) intermediate
    # instead of materializing (hidden, tile).  Static slices are zero-cost ref views.
    for c in range(n_chunks):
        lo, hi = c * chunk, (c + 1) * chunk
        xc = x_ref[lo:hi, :]                                   # (chunk, c_in)

        # Layer 1 (BN folded): contract c_in of x against c_in of W1^T so the result
        # is already channels-first: (hidden, chunk).
        h = jax.lax.dot_general(w1, xc, (((1,), (1,)), ((), ())),
                                preferred_element_type=jnp.float32)
        h = jnp.maximum(h + b1, 0.0)

        # Layer 2: (num_classes, hidden) @ (hidden, chunk) -> (num_classes, chunk)
        out = jnp.dot(w2, h, preferred_element_type=jnp.float32) + b2
        o_ref[:, lo:hi] = out.astype(o_ref.dtype)


def _round_up(x, m):
    return ((x + m - 1) // m) * m


def _pick_tiles(N, tile_n, chunk_n):
    """Point-tile (DMA block) and in-kernel chunk sizes; chunk | tile, both mult of 128."""
    n128 = _round_up(max(int(N), 1), 128)
    chunk = max(128, min(_round_up(chunk_n, 128), n128))
    tile = max(chunk, min(_round_up(tile_n, chunk), _round_up(n128, chunk)))
    # keep >= 2 grid steps when the problem is big enough so both v7x TCs get work
    if tile >= n128 and n128 >= 2 * chunk:
        tile = _round_up(pl.cdiv(n128, 2), chunk)
    return tile, chunk


@functools.partial(jax.jit, static_argnames=("tile_n", "chunk_n"))
def mini_pointnet_forward(feats, params, *, tile_n=16384, chunk_n=512):
    """feats: [N, C_in] float32 point features. Returns [N, num_classes]."""
    N, c_in = feats.shape
    hidden = params["w1"].shape[1]
    num_classes = params["w2"].shape[1]

    # ---- Fold eval-mode BatchNorm into layer 1 (fuses under jit; no extra HBM pass) ----
    inv_std = jax.lax.rsqrt(params["var"] + BN_EPS)        # (c_in,)
    s = params["gamma"] * inv_std                          # (c_in,)
    t = params["beta"] - params["mean"] * s                # (c_in,)
    w1f = params["w1"] * s[:, None]                        # (c_in, hidden)
    b1f = params["b1"] + t @ params["w1"]                  # (hidden,)

    # ---- Tiny parameter operands, channels-first for the in-kernel dots ----
    w1t = w1f.T                                            # (hidden, c_in)
    b1c = b1f[:, None]                                     # (hidden, 1)
    w2t = params["w2"].T                                   # (num_classes, hidden)
    b2c = params["b2"][:, None]                            # (num_classes, 1)

    tile, chunk = _pick_tiles(N, tile_n, chunk_n)
    grid = (pl.cdiv(N, tile),)                             # ragged final block is masked

    cost = pl.CostEstimate(
        flops=2 * N * (c_in * hidden + hidden * num_classes),
        transcendentals=0,
        bytes_accessed=4 * N * (c_in + num_classes),
    )

    def const2d(shape):
        # loop-invariant parameter block: whole array, same block every grid step
        return pl.BlockSpec(shape, lambda i: (0, 0))

    kernel = functools.partial(_mini_pointnet_kernel, chunk=chunk)

    out_cf = pl.pallas_call(
        kernel,
        out_shape=jax.ShapeDtypeStruct((num_classes, N), jnp.float32),
        grid_spec=pltpu.PrefetchScalarGridSpec(
            num_scalar_prefetch=0,
            grid=grid,
            in_specs=[
                pl.BlockSpec((tile, c_in), lambda i: (i, 0)),   # native-layout x tile
                const2d((hidden, c_in)),                        # folded W1^T
                const2d((hidden, 1)),                           # folded b1
                const2d((num_classes, hidden)),                 # W2^T
                const2d((num_classes, 1)),                      # b2
            ],
            out_specs=pl.BlockSpec((num_classes, tile), lambda i: (0, i)),
        ),
        compiler_params=pltpu.CompilerParams(
            dimension_semantics=("parallel",),
            vmem_limit_bytes=48 * 1024 * 1024,
        ),
        cost_estimate=cost,
    )(feats, w1t, b1c, w2t, b2c)

    # Channels-first -> [N, num_classes]; only 8*N bytes of layout plumbing under jit.
    return out_cf.T


def init_params(key, in_channels, hidden, num_classes):
    k1, k2, k3, k4 = jax.random.split(key, 4)
    # PyTorch-like Linear init: U(-1/sqrt(fan_in), 1/sqrt(fan_in))
    bound1 = 1.0 / jnp.sqrt(jnp.float32(in_channels))
    bound2 = 1.0 / jnp.sqrt(jnp.float32(hidden))
    return {
        # BatchNorm params (PyTorch defaults: gamma=1, beta=0, mean=0, var=1)
        "gamma": jnp.ones((in_channels,), jnp.float32),
        "beta": jnp.zeros((in_channels,), jnp.float32),
        "mean": jnp.zeros((in_channels,), jnp.float32),
        "var": jnp.ones((in_channels,), jnp.float32),
        # layer1: Linear(in_channels, 128)  (stored as [in, out] = W.T)
        "w1": jax.random.uniform(k1, (in_channels, hidden), jnp.float32,
                                 -bound1, bound1),
        "b1": jax.random.uniform(k2, (hidden,), jnp.float32, -bound1, bound1),
        # layer2: Linear(128, num_classes)
        "w2": jax.random.uniform(k3, (hidden, num_classes), jnp.float32,
                                 -bound2, bound2),
        "b2": jax.random.uniform(k4, (num_classes,), jnp.float32,
                                 -bound2, bound2),
    }


if __name__ == "__main__":
    key = jax.random.PRNGKey(0)
    in_channels, hidden, num_classes = 4, 128, 2
    n_points = 1000  # NOT a multiple of 128/tile — exercises the ragged (masked) final block

    kx, kp, kb = jax.random.split(key, 3)
    feats = jax.random.normal(kx, (n_points, in_channels), jnp.float32)
    params = init_params(kp, in_channels, hidden, num_classes)
    # non-trivial BN running stats so the folding is actually tested
    params["mean"] = 0.1 * jax.random.normal(kb, (in_channels,), jnp.float32)
    params["var"] = jnp.abs(params["mean"]) + 1.0
    params["gamma"] = params["gamma"] * 1.3
    params["beta"] = params["beta"] + 0.05

    # small tile/chunk in the demo so the grid has 2 (parallel) steps and the
    # in-kernel chunk loop runs twice per step
    out = mini_pointnet_forward(feats, params, tile_n=512, chunk_n=256)
    out = jax.block_until_ready(out)

    # reference check in plain JAX (original, un-folded formulation)
    xn = (feats - params["mean"]) * jax.lax.rsqrt(params["var"] + BN_EPS) \
         * params["gamma"] + params["beta"]
    h = jnp.maximum(xn @ params["w1"] + params["b1"], 0.0)
    ref = h @ params["w2"] + params["b2"]

    assert out.shape == (n_points, num_classes)
    assert jnp.allclose(out, ref, atol=2e-4, rtol=2e-4), \
        float(jnp.max(jnp.abs(out - ref)))

    print("KERNEL_OK")
</pallas_src>

<mosaic_0001>
module attributes {stable_mosaic.version = 11 : i64} {
  func.func @_mini_pointnet_kernel(%arg0: i32, %arg1: memref<512x4xf32, #tpu.memory_space<vmem>>, %arg2: memref<128x4xf32, #tpu.memory_space<vmem>>, %arg3: memref<128x1xf32, #tpu.memory_space<vmem>>, %arg4: memref<2x128xf32, #tpu.memory_space<vmem>>, %arg5: memref<2x1xf32, #tpu.memory_space<vmem>>, %arg6: memref<2x512xf32, #tpu.memory_space<vmem>>) attributes {dimension_semantics = [#tpu.dimension_semantics<parallel>], iteration_bounds = array<i64: 2>, scalar_prefetch = 0 : i64, scratch_operands = 0 : i64, tpu.core_type = #tpu.core_type<tc>, window_params = [{transform_indices = @transform_0, window_bounds = array<i64: 512, 4>}, {pipeline_mode = #tpu.pipeline_mode<synchronous>, transform_indices = @transform_1, window_bounds = array<i64: 128, 4>}, {pipeline_mode = #tpu.pipeline_mode<synchronous>, transform_indices = @transform_2, window_bounds = array<i64: 128, 1>}, {pipeline_mode = #tpu.pipeline_mode<synchronous>, transform_indices = @transform_3, window_bounds = array<i64: 2, 128>}, {pipeline_mode = #tpu.pipeline_mode<synchronous>, transform_indices = @transform_4, window_bounds = array<i64: 2, 1>}, {transform_indices = @transform_5, window_bounds = array<i64: 2, 512>}]} {
    %c0 = arith.constant 0 : index
    %c0_0 = arith.constant 0 : index
    %0 = vector.load %arg2[%c0, %c0_0] : memref<128x4xf32, #tpu.memory_space<vmem>>, vector<128x4xf32>
    %c0_1 = arith.constant 0 : index
    %c0_2 = arith.constant 0 : index
    %1 = vector.load %arg3[%c0_1, %c0_2] : memref<128x1xf32, #tpu.memory_space<vmem>>, vector<128x1xf32>
    %c0_3 = arith.constant 0 : index
    %c0_4 = arith.constant 0 : index
    %2 = vector.load %arg4[%c0_3, %c0_4] : memref<2x128xf32, #tpu.memory_space<vmem>>, vector<2x128xf32>
    %c0_5 = arith.constant 0 : index
    %c0_6 = arith.constant 0 : index
    %3 = vector.load %arg5[%c0_5, %c0_6] : memref<2x1xf32, #tpu.memory_space<vmem>>, vector<2x1xf32>
    %c0_7 = arith.constant 0 : index
    %c0_8 = arith.constant 0 : index
    %4 = vector.load %arg1[%c0_7, %c0_8] : memref<512x4xf32, #tpu.memory_space<vmem>>, vector<256x4xf32>
    %cst = arith.constant dense<0.000000e+00> : vector<128x256xf32>
    %5 = tpu.matmul %0, %4, %cst {dimension_numbers = #tpu.dot_dimension_numbers<[1], [1], [0], [0], [0, 0, 1, 0], [], []>} : vector<128x4xf32>, vector<256x4xf32>, vector<128x256xf32> -> vector<128x256xf32>
    %6 = vector.broadcast %1 : vector<128x1xf32> to vector<128x256xf32>
    %7 = arith.addf %5, %6 : vector<128x256xf32>
    %cst_9 = arith.constant 0.000000e+00 : f32
    %8 = vector.broadcast %cst_9 : f32 to vector<128x256xf32>
    %9 = arith.maximumf %7, %8 : vector<128x256xf32>
    %cst_10 = arith.constant dense<0.000000e+00> : vector<2x256xf32>
    %10 = tpu.matmul %2, %9, %cst_10 {dimension_numbers = #tpu.dot_dimension_numbers<[1], [0], [0], [1], [0, 0, 1, 1], [], []>} : vector<2x128xf32>, vector<128x256xf32>, vector<2x256xf32> -> vector<2x256xf32>
    %11 = vector.broadcast %3 : vector<2x1xf32> to vector<2x256xf32>
    %12 = arith.addf %10, %11 : vector<2x256xf32>
    %c0_11 = arith.constant 0 : index
    %c0_12 = arith.constant 0 : index
    %13 = vector.load %arg6[%c0_11, %c0_12] : memref<2x512xf32, #tpu.memory_space<vmem>>, vector<2x256xf32>
    tpu.vector_store %arg6[%c0_11, %c0_12], %12 {strides = array<i32>} : memref<2x512xf32, #tpu.memory_space<vmem>>, vector<2x256xf32>,
    %c256 = arith.constant 256 : index
    %c0_13 = arith.constant 0 : index
    %14 = vector.load %arg1[%c256, %c0_13] : memref<512x4xf32, #tpu.memory_space<vmem>>, vector<256x4xf32>
    %cst_14 = arith.constant dense<0.000000e+00> : vector<128x256xf32>
    %15 = tpu.matmul %0, %14, %cst_14 {dimension_numbers = #tpu.dot_dimension_numbers<[1], [1], [0], [0], [0, 0, 1, 0], [], []>} : vector<128x4xf32>, vector<256x4xf32>, vector<128x256xf32> -> vector<128x256xf32>
    %16 = vector.broadcast %1 : vector<128x1xf32> to vector<128x256xf32>
    %17 = arith.addf %15, %16 : vector<128x256xf32>
    %cst_15 = arith.constant 0.000000e+00 : f32
    %18 = vector.broadcast %cst_15 : f32 to vector<128x256xf32>
    %19 = arith.maximumf %17, %18 : vector<128x256xf32>
    %cst_16 = arith.constant dense<0.000000e+00> : vector<2x256xf32>
    %20 = tpu.matmul %2, %19, %cst_16 {dimension_numbers = #tpu.dot_dimension_numbers<[1], [0], [0], [1], [0, 0, 1, 1], [], []>} : vector<2x128xf32>, vector<128x256xf32>, vector<2x256xf32> -> vector<2x256xf32>
    %21 = vector.broadcast %3 : vector<2x1xf32> to vector<2x256xf32>
    %22 = arith.addf %20, %21 : vector<2x256xf32>
    %c0_17 = arith.constant 0 : index
    %c256_18 = arith.constant 256 : index
    %23 = vector.load %arg6[%c0_17, %c256_18] : memref<2x512xf32, #tpu.memory_space<vmem>>, vector<2x256xf32>
    tpu.vector_store %arg6[%c0_17, %c256_18], %22 {strides = array<i32>} : memref<2x512xf32, #tpu.memory_space<vmem>>, vector<2x256xf32>,
    return
  }
  func.func @transform_0(%arg0: i32) -> (i32, i32) {
    %c0_i32 = arith.constant 0 : i32
    %c0_i32_0 = arith.constant 0 : i32
    return %arg0, %c0_i32 : i32, i32
  }
  func.func @transform_1(%arg0: i32) -> (i32, i32) {
    %c0_i32 = arith.constant 0 : i32
    %c0_i32_0 = arith.constant 0 : i32
    %c0_i32_1 = arith.constant 0 : i32
    return %c0_i32, %c0_i32_0 : i32, i32
  }
  func.func @transform_2(%arg0: i32) -> (i32, i32) {
    %c0_i32 = arith.constant 0 : i32
    %c0_i32_0 = arith.constant 0 : i32
    %c0_i32_1 = arith.constant 0 : i32
    return %c0_i32, %c0_i32_0 : i32, i32
  }
  func.func @transform_3(%arg0: i32) -> (i32, i32) {
    %c0_i32 = arith.constant 0 : i32
    %c0_i32_0 = arith.constant 0 : i32
    %c0_i32_1 = arith.constant 0 : i32
    return %c0_i32, %c0_i32_0 : i32, i32
  }
  func.func @transform_4(%arg0: i32) -> (i32, i32) {
    %c0_i32 = arith.constant 0 : i32
    %c0_i32_0 = arith.constant 0 : i32
    %c0_i32_1 = arith.constant 0 : i32
    return %c0_i32, %c0_i32_0 : i32, i32
  }
  func.func @transform_5(%arg0: i32) -> (i32, i32) {
    %c0_i32 = arith.constant 0 : i32
    %c0_i32_0 = arith.constant 0 : i32
    return %c0_i32, %arg0 : i32, i32
  }
}

</mosaic_0001>

<bundles_post_ra>
// kernel: mini_pointnet_forward.1
= control target key start
LH: loop header
LB: loop body
LE: loop exit
PB: predicated region body
PF: predicated region fallthrough
CT: control target
= control target key end

     0   :  { %10 = vsyncpa [#allocation3], 0  ;;  %s2356_s0 = inlined_call_operand.vmem [shape: f32[1000,4], index: 0, kind: input, shape index: {}]   ;;  %s2357_s1 = inlined_call_operand.vmem [shape: f32[128,4], index: 1, kind: input, shape index: {}]   ;;  %s2358_s2 = inlined_call_operand.vmem [shape: f32[128,1], index: 2, kind: input, shape index: {}]   ;;  %s2359_s3 = inlined_call_operand.vmem [shape: f32[2,128], index: 3, kind: input, shape index: {}]   ;;  %s2360_s4 = inlined_call_operand.vmem [shape: f32[2,1], index: 4, kind: input, shape index: {}]   ;;  %s2361_s5 = inlined_call_operand.hbm [shape: f32[2,1000], index: 5, kind: output, shape index: {}]  }
   0x1   :  { %12 = vsyncpa [#allocation3 + $0x1], 0  ;;  %s1673_s18 = smov 0   ;;  %s1675_s19 = smov 0  }
   0x2   :  { %s1677_s20 = smov 0   ;;  %s1679_s21 = smov 0  }
   0x3 LB: > { %s1694_s22 = sadd.s32 4294967295, %s1638_s21   ;;  %s1296_s23 = sadd.s32 4294967294, %s1638_s21   ;;  %s1638_s21 = sphi %s1679_s21, %s2379_s21   ;;  %s1634_s20 = sphi %s1677_s20, %s2378_s20   ;;  %s1630_s19 = sphi %s1675_s19, %s2377_s19   ;;  %s1626_s18 = sphi %s1673_s18, %s2376_s18  }
   0x4   : > { %s1698_s24 = sadd.s32 1, %s1638_s21   ;;  %s135_s25 = sadd.s32 1, %s1634_s20 }
   0x5   : > { %s132_s26 = ssub.s32 %s1638_s21, %s1698_s24  ;;  %p145_p0 = scmp.ne.s32.totalorder %s1634_s20, %s1630_s19 }
   0x6   : > { %p133_p1 = scmp.eq.s32.totalorder %s132_s26, 0  ;;  %p146_p2 = scmp.eq.s32.totalorder %s1694_s22, 1 }
   0x7   : > { %p151_p3 = scmp.ne.s32.totalorder %s1630_s19, %s1626_s18  ;;  %p152_p4 = scmp.eq.s32.totalorder %s1296_s23, 1 }
   0x8   : > { %s1709_s27 = scalar_select %p133_p1, %s1634_s20, %s135_s25  }
   0x9   : > { %p1711_p5 = por %p146_p2, %p145_p0  ;;  %p1715_p6 = por %p152_p4, %p151_p3 }
   0xa   : > { %p1299_p7 = scmp.ge.s32.totalorder %s1638_s21, 1  ;;  %p199_p8 = scmp.lt.s32.totalorder %s1638_s21, 3 }
   0xc   : > { %p200_p9 = pnand %p1299_p7, %p199_p8 }
   0xe   : > { %203 = sbr.rel (%p200_p9) target bundleno = 948 (0x3b4), region = 40 }
  0x13   : > { %s1301_s30 = sshll.u32 %s1694_s22, 6  ;;  %vm392_vm0 = vcmask 31744   ;;  %v1725_v0 = vld [vmem:[%s2357_s1] sm:$0xff]  ;;  %v1640_v1 = vmov 0   ;;  %v275_v2 = vld [vmem:[%s2358_s2 + $0x68] sm:$0xff]  ;;  %v277_v3 = vld [vmem:[%s2358_s2 + $0x78] sm:$0xff] }
  0x14   : > { %p236_p10 = scmp.lt.s32.totalorder %s1301_s30, 124  ;;  %1439 = vmatprep.mubr.msk.f32.mxu0 %vm392_vm0, %v1725_v0  ;;  %1577 = vset.pattern.permute.xlu1 %v1640_v1  ;;  %v274_v4 = vld [vmem:[%s2358_s2 + $0x60] sm:$0xff]  ;;  %v276_v5 = vld [vmem:[%s2358_s2 + $0x70] sm:$0xff]  ;;  %v273_v11 = vld [vmem:[%s2358_s2 + $0x58] sm:$0xff]  ;;  %s1406_s26 = sshll.u32 %s1694_s22, 7 }
  0x15   : > { %1576 = vset.pattern.permute.xlu0 %v1640_v1  ;;  %379 = vperm.xlu1 %1577, %v275_v2   ;;  %v272_v9 = vld [vmem:[%s2358_s2 + $0x50] sm:$0xff]  ;;  %v270_v13 = vld [vmem:[%s2358_s2 + $0x40] sm:$0xff]  ;;  %v271_v17 = vld [vmem:[%s2358_s2 + $0x48] sm:$0xff]  ;;  %s1235_s8 = scalar_lea.hbm %s2361_s5, %s1406_s26  ;;  %s1642_s22 = smov [#allocation2]  }
  0x16   : > { %s2381_s30 = smov (!%p236_p10, %s1301_s30), 124  ;;  %389 = vperm.xlu0 %1576, %v277_v3   ;;  %v268_v18 = vld [vmem:[%s2358_s2 + $0x30] sm:$0xff]  ;;  %v269_v20 = vld [vmem:[%s2358_s2 + $0x38] sm:$0xff]  ;;  %v266_v21 = vld [vmem:[%s2358_s2 + $0x20] sm:$0xff]  ;;  %v1641_v3 = vmov 0.0   ;;  %s1582_s11 = sshll.u32 %s1642_s22, 4  ;;  %s1583_s11 = int_to_ptr.vmem [resolvable:$false] %s1582_s11 }
  0x17   : > { %s1302_s12 = sshll.u32 %s2381_s30, 3  ;;  %v267_v24 = vld [vmem:[%s2358_s2 + $0x28] sm:$0xff]  ;;  %v264_v25 = vld [vmem:[%s2358_s2 + $0x10] sm:$0xff]  ;;  %v265_v28 = vld [vmem:[%s2358_s2 + $0x18] sm:$0xff]  ;;  %799 = vmatprep.mubr.f32.mxu1 %v1641_v3 }
  0x18   : > { %s1741_s17 = scalar_lea.vmem %s2356_s0, %s1302_s12  ;;  %v262_v29 = vld [vmem:[%s2358_s2] sm:$0xff]  ;;  %v263_v32 = vld [vmem:[%s2358_s2 + $0x8] sm:$0xff]  ;;  %v1861_v52 = vld [vmem:[%s2357_s1 + $0x10] sm:$0xff]  ;;  %s1584_s12 = scalar_lea.vmem %s1583_s11, 256 }
  0x19   : > { %v311_v6 = vld [vmem:[%s1741_s17 + $0xf8] sm:$0xff]  ;;  %v310_v8 = vld [vmem:[%s1741_s17 + $0xf0] sm:$0xff]  ;;  %374 = vperm.xlu1 %1577, %v274_v4   ;;  %v309_v12 = vld [vmem:[%s1741_s17 + $0xe8] sm:$0xff] }
  0x1a   : > { %v295_v7 = vld [vmem:[%s1741_s17 + $0x78] sm:$0xff]  ;;  %1407 = vmatprep.subr.msk.mxu0 %vm392_vm0, %v311_v6  ;;  %384 = vperm.xlu0 %1576, %v276_v5   ;;  %v294_v10 = vld [vmem:[%s1741_s17 + $0x70] sm:$0xff]  ;;  %v293_v14 = vld [vmem:[%s1741_s17 + $0x68] sm:$0xff] }
  0x1b   : > { %1408 = vmatpush3.xpose.msk.msra.mxu0 %vm392_vm0, %v295_v7  ;;  %v308_v15 = vld [vmem:[%s1741_s17 + $0xe0] sm:$0xff]  ;;  %v307_v19 = vld [vmem:[%s1741_s17 + $0xd8] sm:$0xff]  ;;  %v306_v23 = vld [vmem:[%s1741_s17 + $0xd0] sm:$0xff] }
  0x1c   : > { %1409 = vmatprep.subr.msk.mxu0 %vm392_vm0, %v310_v8  ;;  %v292_v16 = vld [vmem:[%s1741_s17 + $0x60] sm:$0xff]  ;;  %v291_v22 = vld [vmem:[%s1741_s17 + $0x58] sm:$0xff]  ;;  %v290_v26 = vld [vmem:[%s1741_s17 + $0x50] sm:$0xff] }
  0x1d   : > { %364 = vperm.xlu1 %1577, %v272_v9   ;;  %v305_v27 = vld [vmem:[%s1741_s17 + $0xc8] sm:$0xff]  ;;  %v304_v31 = vld [vmem:[%s1741_s17 + $0xc0] sm:$0xff]  ;;  %v303_v34 = vld [vmem:[%s1741_s17 + $0xb8] sm:$0xff] }
  0x1e   : > { %369 = vperm.xlu0 %1576, %v273_v11   ;;  %v289_v30 = vld [vmem:[%s1741_s17 + $0x48] sm:$0xff]  ;;  %v288_v33 = vld [vmem:[%s1741_s17 + $0x40] sm:$0xff]  ;;  %v287_v36 = vld [vmem:[%s1741_s17 + $0x38] sm:$0xff] }
  0x1f   : > { %1410 = vmatpush3.xpose.msk.msra.mxu0 %vm392_vm0, %v294_v10  ;;  %v279_v35 = vld [vmem:[%s2360_s4] sm:$0x3]  ;;  %v302_v37 = vld [vmem:[%s1741_s17 + $0xb0] sm:$0xff]  ;;  %v301_v39 = vld [vmem:[%s1741_s17 + $0xa8] sm:$0xff] }
  0x20   : > { %1411 = vmatprep.subr.msk.mxu0 %vm392_vm0, %v309_v12  ;;  %v286_v38 = vld [vmem:[%s1741_s17 + $0x30] sm:$0xff]  ;;  %v285_v40 = vld [vmem:[%s1741_s17 + $0x28] sm:$0xff]  ;;  %v300_v41 = vld [vmem:[%s1741_s17 + $0xa0] sm:$0xff] }
  0x21   : > { %354 = vperm.xlu1 %1577, %v270_v13   ;;  %v284_v42 = vld [vmem:[%s1741_s17 + $0x20] sm:$0xff]  ;;  %v299_v43 = vld [vmem:[%s1741_s17 + $0x98] sm:$0xff]  ;;  %v298_v45 = vld [vmem:[%s1741_s17 + $0x90] sm:$0xff] }
  0x22   : > { %359 = vperm.xlu0 %1576, %v271_v17   ;;  %v283_v44 = vld [vmem:[%s1741_s17 + $0x18] sm:$0xff]  ;;  %v282_v46 = vld [vmem:[%s1741_s17 + $0x10] sm:$0xff]  ;;  %v297_v47 = vld [vmem:[%s1741_s17 + $0x88] sm:$0xff] }
  0x23   : > { %1412 = vmatpush3.xpose.msk.msra.mxu0 %vm392_vm0, %v293_v14  ;;  %v281_v48 = vld [vmem:[%s1741_s17 + $0x8] sm:$0xff]  ;;  %v296_v49 = vld [vmem:[%s1741_s17 + $0x80] sm:$0xff]  ;;  %v1870_v53 = vld [vmem:[%s2357_s1 + $0x18] sm:$0xff] }
  0x24   : > { %1413 = vmatprep.subr.msk.mxu0 %vm392_vm0, %v308_v15  ;;  %v280_v50 = vld [vmem:[%s1741_s17] sm:$0xff]  ;;  %v1852_v51 = vld [vmem:[%s2357_s1 + $0x8] sm:$0xff]  ;;  %v1897_v56 = vld [vmem:[%s2357_s1 + $0x30] sm:$0xff] }
  0x25   : > { %344 = vperm.xlu1 %1577, %v268_v18   ;;  %v1879_v54 = vld [vmem:[%s2357_s1 + $0x20] sm:$0xff]  ;;  %v1888_v55 = vld [vmem:[%s2357_s1 + $0x28] sm:$0xff]  ;;  %v1906_v57 = vld [vmem:[%s2357_s1 + $0x38] sm:$0xff] }
  0x26   : > { %349 = vperm.xlu0 %1576, %v269_v20   ;;  %v1915_v58 = vld [vmem:[%s2357_s1 + $0x40] sm:$0xff]  ;;  %v1924_v59 = vld [vmem:[%s2357_s1 + $0x48] sm:$0xff]  ;;  %v1933_v60 = vld [vmem:[%s2357_s1 + $0x50] sm:$0xff] }
  0x27   : > { %1414 = vmatpush3.xpose.msk.msra.mxu0 %vm392_vm0, %v292_v16  ;;  %v1942_v61 = vld [vmem:[%s2357_s1 + $0x58] sm:$0xff]  ;;  %v1951_v62 = vld [vmem:[%s2357_s1 + $0x60] sm:$0xff]  ;;  %v1960_v63 = vld [vmem:[%s2357_s1 + $0x68] sm:$0xff] }
  0x28   : > { %1415 = vmatprep.subr.msk.mxu0 %vm392_vm0, %v307_v19  ;;  %2370 = vst [vmem:[#allocation5_spill] sm:$0xff] %v1960_v63  ;;  %v1969_v1 = vld [vmem:[%s2357_s1 + $0x70] sm:$0xff]  ;;  %v1978_v2 = vld [vmem:[%s2357_s1 + $0x78] sm:$0xff] }
  0x29   : > { %334 = vperm.xlu1 %1577, %v266_v21   ;;  %2371 = vst [vmem:[#allocation6_spill] sm:$0xff] %v1969_v1  ;;  %2372 = vst [vmem:[#allocation7_spill] sm:$0xff] %v1978_v2 }
  0x2a   : > { %339 = vperm.xlu0 %1576, %v267_v24  }
  0x2b   : > { %1416 = vmatpush3.xpose.msk.msra.mxu0 %vm392_vm0, %v291_v22 }
  0x2c   : > { %1417 = vmatprep.subr.msk.mxu0 %vm392_vm0, %v306_v23 }
  0x2d   : > { %324 = vperm.xlu1 %1577, %v264_v25  }
  0x2e   : > { %329 = vperm.xlu0 %1576, %v265_v28  }
  0x2f   : > { %1418 = vmatpush3.xpose.msk.msra.mxu0 %vm392_vm0, %v290_v26 }
  0x30   : > { %1419 = vmatprep.subr.msk.mxu0 %vm392_vm0, %v305_v27 }
  0x31   : > { %314 = vperm.xlu1 %1577, %v262_v29  }
  0x32   : > { %319 = vperm.xlu0 %1576, %v263_v32  }
  0x33   : > { %1420 = vmatpush3.xpose.msk.msra.mxu0 %vm392_vm0, %v289_v30 }
  0x34   : > { %1421 = vmatprep.subr.msk.mxu0 %vm392_vm0, %v304_v31 }
  0x36   : > { %732 = vperm.xlu0 %1576, %v279_v35  }
  0x37   : > { %1422 = vmatpush3.xpose.msk.msra.mxu0 %vm392_vm0, %v288_v33 }
  0x38   : > { %1423 = vmatprep.subr.msk.mxu0 %vm392_vm0, %v303_v34 }
  0x3b   : > { %1424 = vmatpush3.xpose.msk.msra.mxu0 %vm392_vm0, %v287_v36 }
  0x3c   : > { %1425 = vmatprep.subr.msk.mxu0 %vm392_vm0, %v302_v37 }
  0x3f   : > { %1426 = vmatpush3.xpose.msk.msra.mxu0 %vm392_vm0, %v286_v38 }
  0x40   : > { %1427 = vmatprep.subr.msk.mxu0 %vm392_vm0, %v301_v39 }
  0x43   : > { %1428 = vmatpush3.xpose.msk.msra.mxu0 %vm392_vm0, %v285_v40 }
  0x44   : > { %1429 = vmatprep.subr.msk.mxu0 %vm392_vm0, %v300_v41 }
  0x47   : > { %1430 = vmatpush3.xpose.msk.msra.mxu0 %vm392_vm0, %v284_v42 }
  0x48   : > { %1431 = vmatprep.subr.msk.mxu0 %vm392_vm0, %v299_v43 }
  0x4b   : > { %1432 = vmatpush3.xpose.msk.msra.mxu0 %vm392_vm0, %v283_v44 }
  0x4c   : > { %1433 = vmatprep.subr.msk.mxu0 %vm392_vm0, %v298_v45 }
  0x4f   : > { %1434 = vmatpush3.xpose.msk.msra.mxu0 %vm392_vm0, %v282_v46 }
  0x50   : > { %1435 = vmatprep.subr.msk.mxu0 %vm392_vm0, %v297_v47 }
  0x53   : > { %1436 = vmatpush3.xpose.msk.msra.mxu0 %vm392_vm0, %v281_v48 }
  0x54   : > { %1437 = vmatprep.subr.msk.mxu0 %vm392_vm0, %v296_v49 }
  0x57   : > { %1438 = vmatpush3.xpose.msk.msra.mxu0 %vm392_vm0, %v280_v50 }
  0x5a   : > { %1440 = vmatmul.mubr.msk.f32.vlgmr.msra.gmra.mxu0 %vm392_vm0, %v1725_v0 }
  0x5b   : > { %1441 = vmatprep.mubr.msk.f32.mxu0 %vm392_vm0, %v1852_v51 }
  0x5e   : > { %1442 = vmatmul.mubr.msk.f32.gmra.mxu0 %vm392_vm0, %v1852_v51 }
  0x5f   : > { %1443 = vmatprep.mubr.msk.f32.mxu0 %vm392_vm0, %v1861_v52 }
  0x62   : > { %1444 = vmatmul.mubr.msk.f32.gmra.mxu0 %vm392_vm0, %v1861_v52 }
  0x63   : > { %1445 = vmatprep.mubr.msk.f32.mxu0 %vm392_vm0, %v1870_v53 }
  0x66   : > { %1446 = vmatmul.mubr.msk.f32.gmra.mxu0 %vm392_vm0, %v1870_v53 }
  0x67   : > { %1447 = vmatprep.mubr.msk.f32.mxu0 %vm392_vm0, %v1879_v54 }
  0x6a   : > { %1448 = vmatmul.mubr.msk.f32.gmra.mxu0 %vm392_vm0, %v1879_v54 }
  0x6b   : > { %1449 = vmatprep.mubr.msk.f32.mxu0 %vm392_vm0, %v1888_v55 }
  0x6e   : > { %1450 = vmatmul.mubr.msk.f32.gmra.mxu0 %vm392_vm0, %v1888_v55 }
  0x6f   : > { %1451 = vmatprep.mubr.msk.f32.mxu0 %vm392_vm0, %v1897_v56 }
  0x72   : > { %1452 = vmatmul.mubr.msk.f32.gmra.mxu0 %vm392_vm0, %v1897_v56 }
  0x73   : > { %1453 = vmatprep.mubr.msk.f32.mxu0 %vm392_vm0, %v1906_v57 }
  0x76   : > { %1454 = vmatmul.mubr.msk.f32.gmra.mxu0 %vm392_vm0, %v1906_v57 }
  0x77   : > { %1455 = vmatprep.mubr.msk.f32.mxu0 %vm392_vm0, %v1915_v58 }
  0x7a   : > { %1456 = vmatmul.mubr.msk.f32.gmra.mxu0 %vm392_vm0, %v1915_v58 }
  0x7b   : > { %1457 = vmatprep.mubr.msk.f32.mxu0 %vm392_vm0, %v1924_v59 }
  0x7e   : > { %1458 = vmatmul.mubr.msk.f32.gmra.mxu0 %vm392_vm0, %v1924_v59 }
  0x7f   : > { %1459 = vmatprep.mubr.msk.f32.mxu0 %vm392_vm0, %v1933_v60 }
  0x82   : > { %1460 = vmatmul.mubr.msk.f32.gmra.mxu0 %vm392_vm0, %v1933_v60 }
  0x83   : > { %1461 = vmatprep.mubr.msk.f32.mxu0 %vm392_vm0, %v1942_v61 }
  0x86   : > { %1462 = vmatmul.mubr.msk.f32.gmra.mxu0 %vm392_vm0, %v1942_v61 }
  0x87   : > { %1463 = vmatprep.mubr.msk.f32.mxu0 %vm392_vm0, %v1951_v62 }
  0x8a   : > { %1464 = vmatmul.mubr.msk.f32.gmra.mxu0 %vm392_vm0, %v1951_v62 }
  0x8b   : > { %1465 = vmatprep.mubr.msk.f32.mxu0 %vm392_vm0, %v1960_v63 }
  0x8e   : > { %1466 = vmatmul.mubr.msk.f32.gmra.mxu0 %vm392_vm0, %v1960_v63 }
  0x8f   : > { %1467 = vmatprep.mubr.msk.f32.mxu0 %vm392_vm0, %v1969_v1 }
  0x90   : > { %v2020_v29 = vpop.permute.xlu1 %379 }
  0x91   : > { %v2018_v27 = vpop.permute.xlu0 %389 }
  0x92   : > { %1468 = vmatmul.mubr.msk.f32.gmra.mxu0 %vm392_vm0, %v1969_v1 }
  0x93   : > { %1469 = vmatprep.mubr.msk.f32.mxu0 %vm392_vm0, %v1978_v2 }
  0x94   : > { %v2024_v34 = vpop.permute.xlu1 %374 }
  0x95   : > { %v2022_v32 = vpop.permute.xlu0 %384 }
  0x96   : > { %1470 = vmatmul.mubr.msk.f32.gmra.mxu0 %vm392_vm0, %v1978_v2 }
  0x97   : > { %1203 = vmatprep.mubr.f32.mxu0 %v1641_v3 }
  0x98   : > { %v2028_v39 = vpop.permute.xlu1 %364 }
  0x99   : > { %v2026_v37 = vpop.permute.xlu0 %369 }
  0x9c   : > { %v2036_v47 = vpop.permute.xlu1 %354 }
  0x9d   : > { %v2031_v43 = vpop.permute.xlu0 %359 }
 0x11a   : > { %v1986_v4 = vpop.f32.mrf.mxu0 }
 0x11c   : > { %v1988_v5 = vpop.f32.mrf.mxu0 }
 0x11e   : > { %v1990_v6 = vpop.f32.mrf.mxu0 }
 0x120   : > { %v1992_v7 = vpop.f32.mrf.mxu0 }
 0x122   : > { %v1994_v8 = vpop.f32.mrf.mxu0 }
 0x124   : > { %v1996_v9 = vpop.f32.mrf.mxu0 }
 0x126   : > { %v1998_v10 = vpop.f32.mrf.mxu0 }
 0x128   : > { %v2000_v11 = vpop.f32.mrf.mxu0 }
 0x12a   : > { %v2002_v12 = vpop.f32.mrf.mxu0 }
 0x12c   : > { %v2004_v13 = vpop.f32.mrf.mxu0 }
 0x12e   : > { %v2006_v14 = vpop.f32.mrf.mxu0 }
 0x130   : > { %v2008_v15 = vpop.f32.mrf.mxu0 }
 0x132   : > { %v2010_v16 = vpop.f32.mrf.mxu0 }
 0x134   : > { %v2012_v17 = vpop.f32.mrf.mxu0 }
 0x136   : > { %v2014_v18 = vpop.f32.mrf.mxu0 }
 0x138   : > { %v2016_v19 = vpop.f32.mrf.mxu0 }
 0x13a   : > { %v651_v20 = vpop.f32.mrf.mxu0 }
 0x13c   : > { %v653_v21 = vpop.f32.mrf.mxu0 }
 0x13e   : > { %v657_v22 = vpop.f32.mrf.mxu0 }
 0x140   : > { %v659_v23 = vpop.f32.mrf.mxu0 }
 0x142   : > { %v663_v24 = vpop.f32.mrf.mxu0 }
 0x144   : > { %v665_v25 = vpop.f32.mrf.mxu0 }
 0x146   : > { %v669_v26 = vpop.f32.mrf.mxu0 }
 0x148   : > { %v671_v28 = vpop.f32.mrf.mxu0 }
 0x14a   : > { %v675_v30 = vpop.f32.mrf.mxu0 }
 0x14b   : > { %v676_v1 = vadd.f32 %v675_v30, %v2024_v34  ;;  %v664_v30 = vadd.f32 %v663_v24, %v2028_v39 }
 0x14c   : > { %v677_v31 = vpop.f32.mrf.mxu0 }
 0x14d   : > { %v678_v2 = vadd.f32 %v677_v31, %v2024_v34  ;;  %v666_v31 = vadd.f32 %v665_v25, %v2028_v39  ;;  %v718_v25 = vmax.f32 %v664_v30, 0.0 }
 0x14e   : > { %v681_v33 = vpop.f32.mrf.mxu0 }
 0x14f   : > { %v682_v50 = vadd.f32 %v681_v33, %v2020_v29  ;;  %v2046_v33 = vpop.permute.xlu1 %344 }
 0x150   : > { %v683_v35 = vpop.f32.mrf.mxu0 }
 0x151   : > { %v684_v48 = vadd.f32 %v683_v35, %v2020_v29  ;;  %v670_v35 = vadd.f32 %v669_v26, %v2026_v37 }
 0x152   : > { %v687_v36 = vpop.f32.mrf.mxu0 }
 0x153   : > { %v688_v46 = vadd.f32 %v687_v36, %v2022_v32  ;;  %v672_v36 = vadd.f32 %v671_v28, %v2026_v37  ;;  %v658_v28 = vadd.f32 %v657_v22, %v2031_v43 }
 0x154   : > { %v689_v38 = vpop.f32.mrf.mxu0 }
 0x155   : > { %v690_v44 = vadd.f32 %v689_v38, %v2022_v32  ;;  %v726_v63 = vmax.f32 %v688_v46, 0.0  ;;  %v2042_v38 = vpop.permute.xlu0 %349  ;;  %v660_v46 = vadd.f32 %v659_v23, %v2031_v43 }
 0x156   : > { %v693_v40 = vpop.f32.mrf.mxu0  ;;  %v648_v23 = vadd.f32 %v2016_v19, %v2042_v38  ;;  %v646_v22 = vadd.f32 %v2014_v18, %v2042_v38 }
 0x157   : > { %v694_v41 = vadd.f32 %v693_v40, %v2018_v27  ;;  %v727_v40 = vmax.f32 %v690_v44, 0.0  ;;  %v722_v44 = vmax.f32 %v676_v1, 0.0  ;;  %v2056_v1 = vpop.permute.xlu1 %334  ;;  %v717_v24 = vmax.f32 %v660_v46, 0.0 }
 0x158   : > { %v695_v42 = vpop.f32.mrf.mxu0 }
 0x159   : > { %v696_v45 = vadd.f32 %v695_v42, %v2018_v27  ;;  %v728_v3 = vmax.f32 %v694_v41, 0.0  ;;  %v725_v42 = vmax.f32 %v684_v48, 0.0  ;;  %v723_v41 = vmax.f32 %v678_v2, 0.0  ;;  %v2052_v26 = vpop.permute.xlu0 %339 }
 0x15a   : > { %v720_v48 = vmax.f32 %v670_v35, 0.0  ;;  %v652_v2 = vadd.f32 %v651_v20, %v2036_v47  ;;  %v640_v20 = vadd.f32 %v2010_v16, %v2046_v33  ;;  %v636_v19 = vadd.f32 %v2008_v15, %v2052_v26 }
 0x15b   : > { %v729_v49 = vmax.f32 %v696_v45, 0.0  ;;  %v724_v45 = vmax.f32 %v682_v50, 0.0  ;;  %v719_v50 = vmax.f32 %v666_v31, 0.0  ;;  %v713_v35 = vmax.f32 %v648_v23, 0.0 }
 0x15c   : > { %v634_v18 = vadd.f32 %v2006_v14, %v2052_v26  ;;  %v630_v31 = vadd.f32 %v2004_v13, %v2056_v1  ;;  %v710_v30 = vmax.f32 %v640_v20, 0.0  ;;  %v847_v20 = vld [vmem:[%s1741_s17 + $0x1e8] sm:$0xff] }
 0x15d   : > { %735 = vmatprep.subr.mxu1 %v729_v49  ;;  %v721_v49 = vmax.f32 %v672_v36, 0.0  ;;  %v714_v36 = vmax.f32 %v652_v2, 0.0 }
 0x15e   : > { %736 = vmatpush1.msra.mxu1 %v728_v3  ;;  %v716_v3 = vmax.f32 %v658_v28, 0.0  ;;  %v708_v46 = vmax.f32 %v634_v18, 0.0  ;;  %v707_v28 = vmax.f32 %v630_v31, 0.0  ;;  %v845_v18 = vld [vmem:[%s1741_s17 + $0x1d8] sm:$0xff]  ;;  %v844_v31 = vld [vmem:[%s1741_s17 + $0x1d0] sm:$0xff] }
 0x15f   : > { %737 = vmatprep.subr.mxu1 %v727_v40 }
 0x160   : > { %738 = vmatpush1.msra.mxu1 %v726_v63  ;;  %v654_v63 = vadd.f32 %v653_v21, %v2036_v47  ;;  %v642_v21 = vadd.f32 %v2012_v17, %v2046_v33  ;;  %v2072_v17 = vpop.permute.xlu1 %324 }
 0x161   : > { %739 = vmatprep.subr.mxu1 %v725_v42  ;;  %v2066_v42 = vpop.permute.xlu0 %329  ;;  %v618_v13 = vadd.f32 %v1996_v9, %v2072_v17 }
 0x162   : > { %740 = vmatpush1.msra.mxu1 %v724_v45  ;;  %v715_v40 = vmax.f32 %v654_v63, 0.0  ;;  %v712_v45 = vmax.f32 %v646_v22, 0.0  ;;  %v711_v16 = vmax.f32 %v642_v21, 0.0  ;;  %v624_v15 = vadd.f32 %v2000_v11, %v2066_v42  ;;  %v848_v21 = vld [vmem:[%s1741_s17 + $0x1f0] sm:$0xff] }
 0x163   : > { %741 = vmatprep.subr.mxu1 %v723_v41  ;;  %v628_v41 = vadd.f32 %v2002_v12, %v2056_v1  ;;  %v622_v14 = vadd.f32 %v1998_v10, %v2066_v42  ;;  %v616_v12 = vadd.f32 %v1994_v8, %v2072_v17 }
 0x164   : > { %742 = vmatpush1.msra.mxu1 %v722_v44  ;;  %v709_v44 = vmax.f32 %v636_v19, 0.0  ;;  %v2088_v11 = vpop.permute.xlu1 %314  ;;  %v705_v10 = vmax.f32 %v624_v15, 0.0  ;;  %v846_v19 = vld [vmem:[%s1741_s17 + $0x1e0] sm:$0xff] }
 0x165   : > { %743 = vmatprep.subr.mxu1 %v721_v49  ;;  %v2082_v49 = vpop.permute.xlu0 %319  ;;  %v704_v2 = vmax.f32 %v622_v14, 0.0  ;;  %v606_v9 = vadd.f32 %v1988_v5, %v2088_v11  ;;  %v604_v8 = vadd.f32 %v1986_v4, %v2088_v11  ;;  %v702_v23 = vmax.f32 %v616_v12, 0.0  ;;  %v2101_v5 = vld [vmem:[%s2359_s3] sm:$0x3]  ;;  %v849_v4 = vld [vmem:[%s1741_s17 + $0x1f8] sm:$0xff]  ;;  %v839_v12 = vld [vmem:[%s1741_s17 + $0x1a8] sm:$0xff] }
 0x166   : > { %744 = vmatpush1.msra.mxu1 %v720_v48  ;;  %v706_v48 = vmax.f32 %v628_v41, 0.0  ;;  %v612_v63 = vadd.f32 %v1992_v7, %v2082_v49  ;;  %v843_v41 = vld [vmem:[%s1741_s17 + $0x1c8] sm:$0xff]  ;;  %v842_v15 = vld [vmem:[%s1741_s17 + $0x1c0] sm:$0xff]  ;;  %v841_v14 = vld [vmem:[%s1741_s17 + $0x1b8] sm:$0xff] }
 0x167   : > { %745 = vmatprep.subr.mxu1 %v719_v50  ;;  %v610_v50 = vadd.f32 %v1990_v6, %v2082_v49  ;;  %v699_v6 = vmax.f32 %v606_v9, 0.0  ;;  %v698_v22 = vmax.f32 %v604_v8, 0.0  ;;  %v836_v9 = vld [vmem:[%s1741_s17 + $0x190] sm:$0xff]  ;;  %v835_v8 = vld [vmem:[%s1741_s17 + $0x188] sm:$0xff] }
 0x168   : > { %746 = vmatpush1.msra.mxu1 %v718_v25  ;;  %v703_v25 = vmax.f32 %v618_v13, 0.0  ;;  %v701_v7 = vmax.f32 %v612_v63, 0.0  ;;  %v840_v13 = vld [vmem:[%s1741_s17 + $0x1b0] sm:$0xff]  ;;  %v838_v63 = vld [vmem:[%s1741_s17 + $0x1a0] sm:$0xff] }
 0x169   : > { %747 = vmatprep.subr.mxu1 %v717_v24  ;;  %v700_v24 = vmax.f32 %v610_v50, 0.0  ;;  %v837_v50 = vld [vmem:[%s1741_s17 + $0x198] sm:$0xff] }
 0x16a   : > { %748 = vmatpush1.msra.mxu1 %v716_v3  ;;  %v833_v3 = vld [vmem:[%s1741_s17 + $0x178] sm:$0xff] }
 0x16b   : > { %749 = vmatprep.subr.mxu1 %v715_v40  ;;  %v832_v40 = vld [vmem:[%s1741_s17 + $0x170] sm:$0xff] }
 0x16c   : > { %750 = vmatpush1.msra.mxu1 %v714_v36  ;;  %v831_v36 = vld [vmem:[%s1741_s17 + $0x168] sm:$0xff] }
 0x16d   : > { %751 = vmatprep.subr.mxu1 %v713_v35  ;;  %v830_v35 = vld [vmem:[%s1741_s17 + $0x160] sm:$0xff] }
 0x16e   : > { %752 = vmatpush1.msra.mxu1 %v712_v45  ;;  %v829_v45 = vld [vmem:[%s1741_s17 + $0x158] sm:$0xff] }
 0x16f   : > { %753 = vmatprep.subr.mxu1 %v711_v16  ;;  %v828_v16 = vld [vmem:[%s1741_s17 + $0x150] sm:$0xff] }
 0x170   : > { %754 = vmatpush1.msra.mxu1 %v710_v30  ;;  %v827_v30 = vld [vmem:[%s1741_s17 + $0x148] sm:$0xff] }
 0x171   : > { %755 = vmatprep.subr.mxu1 %v709_v44  ;;  %v826_v44 = vld [vmem:[%s1741_s17 + $0x140] sm:$0xff] }
 0x172   : > { %756 = vmatpush1.msra.mxu1 %v708_v46  ;;  %v825_v46 = vld [vmem:[%s1741_s17 + $0x138] sm:$0xff] }
 0x173   : > { %757 = vmatprep.subr.mxu1 %v707_v28  ;;  %v824_v28 = vld [vmem:[%s1741_s17 + $0x130] sm:$0xff] }
 0x174   : > { %758 = vmatpush1.msra.mxu1 %v706_v48  ;;  %v823_v48 = vld [vmem:[%s1741_s17 + $0x128] sm:$0xff] }
 0x175   : > { %759 = vmatprep.subr.mxu1 %v705_v10  ;;  %v822_v10 = vld [vmem:[%s1741_s17 + $0x120] sm:$0xff] }
 0x176   : > { %760 = vmatpush1.msra.mxu1 %v704_v2  ;;  %v821_v2 = vld [vmem:[%s1741_s17 + $0x118] sm:$0xff] }
 0x177   : > { %761 = vmatprep.subr.mxu1 %v703_v25  ;;  %v820_v25 = vld [vmem:[%s1741_s17 + $0x110] sm:$0xff] }
 0x178   : > { %762 = vmatpush1.msra.mxu1 %v702_v23  ;;  %v819_v23 = vld [vmem:[%s1741_s17 + $0x108] sm:$0xff] }
 0x179   : > { %763 = vmatprep.subr.mxu1 %v701_v7  ;;  %v834_v7 = vld [vmem:[%s1741_s17 + $0x180] sm:$0xff] }
 0x17a   : > { %764 = vmatpush1.msra.mxu1 %v700_v24  ;;  %v818_v24 = vld [vmem:[%s1741_s17 + $0x100] sm:$0xff]  ;;  %s228_s17 = sand.u32 1, %s1630_s19  }
 0x17b   : > { %765 = vmatprep.subr.mxu1 %v699_v6  ;;  %s1300_s23 = sshll.u32 %s228_s17, 3  ;;  %s1223_s9 = scalar_lea.sflag [#allocation3], %s228_s17 }
 0x17c   : > { %766 = vmatpush1.msra.mxu1 %v698_v22  ;;  %s2239_s25 = scalar_lea.vmem [#allocation2], %s1300_s23 }
 0x17d   : > { %800 = vmatmul.mubr.f32.vlgmr.msra.gmra.mxu1 %v2101_v5  ;;  %1471 = vmatprep.subr.msk.mxu1 %vm392_vm0, %v849_v4  ;;  %s1237_s30 = sshll.u32 %s2239_s25, 4  ;;  %s1238_s30 = int_to_ptr.vmem [resolvable:$true] %s1237_s30 }
 0x17e   : > { %1472 = vmatpush3.xpose.msk.msra.mxu1 %vm392_vm0, %v833_v3  ;;  %1503 = vmatprep.mubr.msk.f32.mxu1 %vm392_vm0, %v1725_v0  ;;  %s1578_s10 = scalar_lea.vmem %s1238_s30, 128  ;;  %p1585_p0 = scmp.lt.s32.totalorder %s1238_s30, %s1583_s11 }
 0x17f   : > { %1473 = vmatprep.subr.msk.mxu1 %vm392_vm0, %v848_v21  ;;  %p1579_p11 = scmp.ne.s32.totalorder %s1238_s30, %s1578_s10  ;;  %p1586_p1 = scmp.lt.s32.totalorder %s1584_s12, %s1578_s10 }
 0x181   : > { %p1580_p12 = pnand %p1579_p11, %p1711_p5  ;;  %p1587_p2 = por %p1586_p1, %p1585_p0 }
 0x182   : > { %1474 = vmatpush3.xpose.msk.msra.mxu1 %vm392_vm0, %v832_v40 }
 0x183   : > { %1475 = vmatprep.subr.msk.mxu1 %vm392_vm0, %v847_v20  ;;  %p1581_p13 = pneg %p1580_p12 }
 0x185   : > { %p1588_p3 = pnand %p1587_p2, %p1581_p13 }
 0x186   : > { %1476 = vmatpush3.xpose.msk.msra.mxu1 %vm392_vm0, %v831_v36 }
 0x187   : > { %1477 = vmatprep.subr.msk.mxu1 %vm392_vm0, %v846_v19 }
 0x18a   : > { %1478 = vmatpush3.xpose.msk.msra.mxu1 %vm392_vm0, %v830_v35 }
 0x18b   : > { %1479 = vmatprep.subr.msk.mxu1 %vm392_vm0, %v845_v18 }
 0x18e   : > { %1480 = vmatpush3.xpose.msk.msra.mxu1 %vm392_vm0, %v829_v45 }
 0x18f   : > { %1481 = vmatprep.subr.msk.mxu1 %vm392_vm0, %v844_v31 }
 0x192   : > { %1482 = vmatpush3.xpose.msk.msra.mxu1 %vm392_vm0, %v828_v16 }
 0x193   : > { %1483 = vmatprep.subr.msk.mxu1 %vm392_vm0, %v843_v41 }
 0x196   : > { %1484 = vmatpush3.xpose.msk.msra.mxu1 %vm392_vm0, %v827_v30 }
 0x197   : > { %1485 = vmatprep.subr.msk.mxu1 %vm392_vm0, %v842_v15 }
 0x19a   : > { %1486 = vmatpush3.xpose.msk.msra.mxu1 %vm392_vm0, %v826_v44 }
 0x19b   : > { %1487 = vmatprep.subr.msk.mxu1 %vm392_vm0, %v841_v14 }
 0x19e   : > { %1488 = vmatpush3.xpose.msk.msra.mxu1 %vm392_vm0, %v825_v46 }
 0x19f   : > { %1489 = vmatprep.subr.msk.mxu1 %vm392_vm0, %v840_v13 }
 0x1a2   : > { %1490 = vmatpush3.xpose.msk.msra.mxu1 %vm392_vm0, %v824_v28 }
 0x1a3   : > { %1491 = vmatprep.subr.msk.mxu1 %vm392_vm0, %v839_v12 }
 0x1a6   : > { %1492 = vmatpush3.xpose.msk.msra.mxu1 %vm392_vm0, %v823_v48 }
 0x1a7   : > { %1493 = vmatprep.subr.msk.mxu1 %vm392_vm0, %v838_v63 }
 0x1aa   : > { %1494 = vmatpush3.xpose.msk.msra.mxu1 %vm392_vm0, %v822_v10 }
 0x1ab   : > { %1495 = vmatprep.subr.msk.mxu1 %vm392_vm0, %v837_v50 }
 0x1ae   : > { %1496 = vmatpush3.xpose.msk.msra.mxu1 %vm392_vm0, %v821_v2 }
 0x1af   : > { %1497 = vmatprep.subr.msk.mxu1 %vm392_vm0, %v836_v9 }
 0x1b2   : > { %1498 = vmatpush3.xpose.msk.msra.mxu1 %vm392_vm0, %v820_v25 }
 0x1b3   : > { %1499 = vmatprep.subr.msk.mxu1 %vm392_vm0, %v835_v8 }
 0x1b6   : > { %1500 = vmatpush3.xpose.msk.msra.mxu1 %vm392_vm0, %v819_v23 }
 0x1b7   : > { %1501 = vmatprep.subr.msk.mxu1 %vm392_vm0, %v834_v7 }
 0x1ba   : > { %1502 = vmatpush3.xpose.msk.msra.mxu1 %vm392_vm0, %v818_v24 }
 0x1bd   : > { %1504 = vmatmul.mubr.msk.f32.vlgmr.msra.gmra.mxu1 %vm392_vm0, %v1725_v0  ;;  %v2373_v0 = vld [vmem:[#allocation5_spill] sm:$0xff] }
 0x1be   : > { %1505 = vmatprep.mubr.msk.f32.mxu1 %vm392_vm0, %v1852_v51 }
 0x1c1   : > { %1506 = vmatmul.mubr.msk.f32.gmra.mxu1 %vm392_vm0, %v1852_v51  ;;  %v2374_v51 = vld [vmem:[#allocation6_spill] sm:$0xff] }
 0x1c2   : > { %1507 = vmatprep.mubr.msk.f32.mxu1 %vm392_vm0, %v1861_v52 }
 0x1c5   : > { %1508 = vmatmul.mubr.msk.f32.gmra.mxu1 %vm392_vm0, %v1861_v52  ;;  %v2375_v52 = vld [vmem:[#allocation7_spill] sm:$0xff] }
 0x1c6   : > { %1509 = vmatprep.mubr.msk.f32.mxu1 %vm392_vm0, %v1870_v53 }
 0x1c9   : > { %1510 = vmatmul.mubr.msk.f32.gmra.mxu1 %vm392_vm0, %v1870_v53 }
 0x1ca   : > { %1511 = vmatprep.mubr.msk.f32.mxu1 %vm392_vm0, %v1879_v54 }
 0x1cd   : > { %1512 = vmatmul.mubr.msk.f32.gmra.mxu1 %vm392_vm0, %v1879_v54  ;;  %v2235_v54 = vpop.permute.xlu0 %732 }
 0x1ce   : > { %1513 = vmatprep.mubr.msk.f32.mxu1 %vm392_vm0, %v1888_v55 }
 0x1d1   : > { %1514 = vmatmul.mubr.msk.f32.gmra.mxu1 %vm392_vm0, %v1888_v55 }
 0x1d2   : > { %1515 = vmatprep.mubr.msk.f32.mxu1 %vm392_vm0, %v1897_v56 }
 0x1d5   : > { %1516 = vmatmul.mubr.msk.f32.gmra.mxu1 %vm392_vm0, %v1897_v56 }
 0x1d6   : > { %1517 = vmatprep.mubr.msk.f32.mxu1 %vm392_vm0, %v1906_v57 }
 0x1d9   : > { %1518 = vmatmul.mubr.msk.f32.gmra.mxu1 %vm392_vm0, %v1906_v57 }
 0x1da   : > { %1519 = vmatprep.mubr.msk.f32.mxu1 %vm392_vm0, %v1915_v58 }
 0x1dd   : > { %1520 = vmatmul.mubr.msk.f32.gmra.mxu1 %vm392_vm0, %v1915_v58 }
 0x1de   : > { %1521 = vmatprep.mubr.msk.f32.mxu1 %vm392_vm0, %v1924_v59 }
 0x1e1   : > { %1522 = vmatmul.mubr.msk.f32.gmra.mxu1 %vm392_vm0, %v1924_v59 }
 0x1e2   : > { %1523 = vmatprep.mubr.msk.f32.mxu1 %vm392_vm0, %v1933_v60 }
 0x1e5   : > { %1524 = vmatmul.mubr.msk.f32.gmra.mxu1 %vm392_vm0, %v1933_v60 }
 0x1e6   : > { %1525 = vmatprep.mubr.msk.f32.mxu1 %vm392_vm0, %v1942_v61 }
 0x1e9   : > { %1526 = vmatmul.mubr.msk.f32.gmra.mxu1 %vm392_vm0, %v1942_v61 }
 0x1ea   : > { %1527 = vmatprep.mubr.msk.f32.mxu1 %vm392_vm0, %v1951_v62 }
 0x1ed   : > { %1528 = vmatmul.mubr.msk.f32.gmra.mxu1 %vm392_vm0, %v1951_v62 }
 0x1ee   : > { %1529 = vmatprep.mubr.msk.f32.mxu1 %vm392_vm0, %v2373_v0 }
 0x1f1   : > { %1530 = vmatmul.mubr.msk.f32.gmra.mxu1 %vm392_vm0, %v2373_v0 }
 0x1f2   : > { %1531 = vmatprep.mubr.msk.f32.mxu1 %vm392_vm0, %v2374_v51 }
 0x1f5   : > { %1532 = vmatmul.mubr.msk.f32.gmra.mxu1 %vm392_vm0, %v2374_v51 }
 0x1f6   : > { %1533 = vmatprep.mubr.msk.f32.mxu1 %vm392_vm0, %v2375_v52 }
 0x1f9   : > { %1534 = vmatmul.mubr.msk.f32.gmra.mxu1 %vm392_vm0, %v2375_v52 }
 0x23d   : > { %v801_v53 = vpop.f32.mrf.mxu1 }
 0x23e   : > { %v802_v56 = vadd.f32 %v801_v53, %v2235_v54 }
 0x23f   : > { %v803_v55 = vpop.f32.mrf.mxu1 }
 0x240   : > { %v804_v57 = vadd.f32 %v803_v55, %v2235_v54 }
 0x242   : > { %v808_v58 = vcombine.low %v802_v56, %v804_v57 }
 0x244   : > { %1351 = vst.sshfl [vmem:[%s2239_s25] sm:$0x33 pattern:$0x76325410] %v808_v58 }
 0x27d   : > { %v2242_v59 = vpop.f32.mrf.mxu1 }
 0x27f   : > { %v2244_v60 = vpop.f32.mrf.mxu1 }
 0x281   : > { %v2246_v61 = vpop.f32.mrf.mxu1 }
 0x283   : > { %v2248_v62 = vpop.f32.mrf.mxu1 }
 0x285   : > { %v2250_v6 = vpop.f32.mrf.mxu1 }
 0x287   : > { %v2252_v22 = vpop.f32.mrf.mxu1 }
 0x289   : > { %v2254_v4 = vpop.f32.mrf.mxu1 }
 0x28b   : > { %v2256_v3 = vpop.f32.mrf.mxu1 }
 0x28d   : > { %v2258_v21 = vpop.f32.mrf.mxu1 }
 0x28f   : > { %v2260_v40 = vpop.f32.mrf.mxu1 }
 0x291   : > { %v2262_v20 = vpop.f32.mrf.mxu1 }
 0x293   : > { %v2264_v36 = vpop.f32.mrf.mxu1 }
 0x295   : > { %v2266_v19 = vpop.f32.mrf.mxu1 }
 0x297   : > { %v2268_v35 = vpop.f32.mrf.mxu1 }
 0x299   : > { %v1054_v18 = vpop.f32.mrf.mxu1 }
 0x29b   : > { %v1056_v45 = vpop.f32.mrf.mxu1 }
 0x29d   : > { %v1060_v31 = vpop.f32.mrf.mxu1 }
 0x29f   : > { %v1062_v16 = vpop.f32.mrf.mxu1 }
 0x2a1   : > { %v1066_v41 = vpop.f32.mrf.mxu1 }
 0x2a3   : > { %v1068_v30 = vpop.f32.mrf.mxu1 }
 0x2a5   : > { %v1072_v15 = vpop.f32.mrf.mxu1 }
 0x2a7   : > { %v1074_v44 = vpop.f32.mrf.mxu1 }
 0x2a9   : > { %v1078_v14 = vpop.f32.mrf.mxu1 }
 0x2ab   : > { %v1080_v46 = vpop.f32.mrf.mxu1 }
 0x2ac   : > { %v1081_v57 = vadd.f32 %v1080_v46, %v2026_v37  ;;  %v1067_v46 = vadd.f32 %v1066_v41, %v2031_v43 }
 0x2ad   : > { %v1084_v13 = vpop.f32.mrf.mxu1 }
 0x2ae   : > { %v1085_v55 = vadd.f32 %v1084_v13, %v2024_v34  ;;  %v1130_v13 = vmax.f32 %v1081_v57, 0.0 }
 0x2af   : > { %v1086_v28 = vpop.f32.mrf.mxu1 }
 0x2b0   : > { %v1087_v52 = vadd.f32 %v1086_v28, %v2024_v34  ;;  %v1073_v28 = vadd.f32 %v1072_v15, %v2028_v39  ;;  %v1069_v34 = vadd.f32 %v1068_v30, %v2031_v43  ;;  %v1055_v30 = vadd.f32 %v1054_v18, %v2042_v38 }
 0x2b1   : > { %v1090_v12 = vpop.f32.mrf.mxu1  ;;  %v1051_v43 = vadd.f32 %v2268_v35, %v2046_v33  ;;  %v1039_v35 = vadd.f32 %v2260_v40, %v2056_v1  ;;  %v1027_v40 = vadd.f32 %v2252_v22, %v2072_v17  ;;  %v1015_v22 = vadd.f32 %v2244_v60, %v2088_v11 }
 0x2b2   : > { %v1091_v0 = vadd.f32 %v1090_v12, %v2020_v29  ;;  %v1131_v12 = vmax.f32 %v1085_v55, 0.0  ;;  %v1126_v15 = vmax.f32 %v1069_v34, 0.0  ;;  %v1121_v18 = vmax.f32 %v1055_v30, 0.0 }
 0x2b3   : > { %v1092_v48 = vpop.f32.mrf.mxu1 }
 0x2b4   : > { %v1093_v7 = vadd.f32 %v1092_v48, %v2020_v29  ;;  %v1075_v48 = vadd.f32 %v1074_v44, %v2028_v39  ;;  %v1132_v29 = vmax.f32 %v1087_v52, 0.0  ;;  %v1061_v44 = vadd.f32 %v1060_v31, %v2036_v47 }
 0x2b5   : > { %v1096_v63 = vpop.f32.mrf.mxu1  ;;  %v1057_v39 = vadd.f32 %v1056_v45, %v2042_v38  ;;  %v1043_v38 = vadd.f32 %v2262_v20, %v2052_v26  ;;  %v1120_v31 = vmax.f32 %v1051_v43, 0.0 }
 0x2b6   : > { %v1097_v23 = vadd.f32 %v1096_v63, %v2022_v32  ;;  %v1134_v58 = vmax.f32 %v1093_v7, 0.0 }
 0x2b7   : > { %v1098_v10 = vpop.f32.mrf.mxu1  ;;  %v1122_v45 = vmax.f32 %v1057_v39, 0.0  ;;  %v1117_v20 = vmax.f32 %v1043_v38, 0.0 }
 0x2b8   : > { %v1099_v25 = vadd.f32 %v1098_v10, %v2022_v32  ;;  %v1135_v56 = vmax.f32 %v1097_v23, 0.0  ;;  %v1133_v32 = vmax.f32 %v1091_v0, 0.0  ;;  %v1127_v10 = vmax.f32 %v1073_v28, 0.0 }
 0x2b9   : > { %v1102_v50 = vpop.f32.mrf.mxu1  ;;  %v1112_v23 = vmax.f32 %v1027_v40, 0.0 }
 0x2ba   : > { %v1103_v2 = vadd.f32 %v1102_v50, %v2018_v27  ;;  %v1136_v53 = vmax.f32 %v1099_v25, 0.0  ;;  %v1125_v50 = vmax.f32 %v1067_v46, 0.0  ;;  %v1116_v25 = vmax.f32 %v1039_v35, 0.0 }
 0x2bb   : > { %v1104_v9 = vpop.f32.mrf.mxu1 }
 0x2bc   : > { %v1105_v8 = vadd.f32 %v1104_v9, %v2018_v27  ;;  %v1137_v51 = vmax.f32 %v1103_v2, 0.0  ;;  %v1079_v27 = vadd.f32 %v1078_v14, %v2026_v37  ;;  %v1063_v37 = vadd.f32 %v1062_v16, %v2036_v47 }
 0x2bd   : > { %v1128_v14 = vmax.f32 %v1075_v48, 0.0  ;;  %v1049_v16 = vadd.f32 %v2266_v19, %v2046_v33  ;;  %v1123_v2 = vmax.f32 %v1061_v44, 0.0  ;;  %v1045_v47 = vadd.f32 %v2264_v36, %v2052_v26 }
 0x2be   : > { %v1138_v24 = vmax.f32 %v1105_v8, 0.0  ;;  %v1129_v63 = vmax.f32 %v1079_v27, 0.0  ;;  %v1124_v41 = vmax.f32 %v1063_v37, 0.0  ;;  %v1037_v33 = vadd.f32 %v2258_v21, %v2056_v1 }
 0x2bf   : > { %v1119_v19 = vmax.f32 %v1049_v16, 0.0  ;;  %v1033_v36 = vadd.f32 %v2256_v3, %v2066_v42  ;;  %v1118_v9 = vmax.f32 %v1045_v47, 0.0  ;;  %v1031_v26 = vadd.f32 %v2254_v4, %v2066_v42 }
 0x2c0   : > { %1139 = vmatprep.subr.mxu0 %v1138_v24  ;;  %v1025_v1 = vadd.f32 %v2250_v6, %v2072_v17  ;;  %v1115_v21 = vmax.f32 %v1037_v33, 0.0  ;;  %v1021_v3 = vadd.f32 %v2248_v62, %v2082_v49  ;;  %v1019_v42 = vadd.f32 %v2246_v61, %v2082_v49 }
 0x2c1   : > { %1140 = vmatpush1.msra.mxu0 %v1137_v51  ;;  %v1114_v8 = vmax.f32 %v1033_v36, 0.0  ;;  %v1113_v4 = vmax.f32 %v1031_v26, 0.0  ;;  %v1013_v17 = vadd.f32 %v2242_v59, %v2088_v11  ;;  %v1108_v24 = vmax.f32 %v1015_v22, 0.0 }
 0x2c2   : > { %1141 = vmatprep.subr.mxu0 %v1136_v53  ;;  %v1111_v6 = vmax.f32 %v1025_v1, 0.0  ;;  %v1110_v62 = vmax.f32 %v1021_v3, 0.0  ;;  %v1109_v7 = vmax.f32 %v1019_v42, 0.0 }
 0x2c3   : > { %1142 = vmatpush1.msra.mxu0 %v1135_v56  ;;  %v1107_v49 = vmax.f32 %v1013_v17, 0.0 }
 0x2c4   : > { %1143 = vmatprep.subr.mxu0 %v1134_v58 }
 0x2c5   : > { %1144 = vmatpush1.msra.mxu0 %v1133_v32 }
 0x2c6   : > { %1145 = vmatprep.subr.mxu0 %v1132_v29 }
 0x2c7   : > { %1146 = vmatpush1.msra.mxu0 %v1131_v12 }
 0x2c8   : > { %1147 = vmatprep.subr.mxu0 %v1130_v13 }
 0x2c9   : > { %1148 = vmatpush1.msra.mxu0 %v1129_v63 }
 0x2ca   : > { %1149 = vmatprep.subr.mxu0 %v1128_v14 }
 0x2cb   : > { %1150 = vmatpush1.msra.mxu0 %v1127_v10 }
 0x2cc   : > { %1151 = vmatprep.subr.mxu0 %v1126_v15 }
 0x2cd   : > { %1152 = vmatpush1.msra.mxu0 %v1125_v50 }
 0x2ce   : > { %1153 = vmatprep.subr.mxu0 %v1124_v41 }
 0x2cf   : > { %1154 = vmatpush1.msra.mxu0 %v1123_v2 }
 0x2d0   : > { %1155 = vmatprep.subr.mxu0 %v1122_v45 }
 0x2d1   : > { %1156 = vmatpush1.msra.mxu0 %v1121_v18 }
 0x2d2   : > { %1157 = vmatprep.subr.mxu0 %v1120_v31 }
 0x2d3   : > { %1158 = vmatpush1.msra.mxu0 %v1119_v19 }
 0x2d4   : > { %1159 = vmatprep.subr.mxu0 %v1118_v9 }
 0x2d5   : > { %1160 = vmatpush1.msra.mxu0 %v1117_v20 }
 0x2d6   : > { %1161 = vmatprep.subr.mxu0 %v1116_v25 }
 0x2d7   : > { %1162 = vmatpush1.msra.mxu0 %v1115_v21 }
 0x2d8   : > { %1163 = vmatprep.subr.mxu0 %v1114_v8 }
 0x2d9   : > { %1164 = vmatpush1.msra.mxu0 %v1113_v4 }
 0x2da   : > { %1165 = vmatprep.subr.mxu0 %v1112_v23 }
 0x2db   : > { %1166 = vmatpush1.msra.mxu0 %v1111_v6 }
 0x2dc   : > { %1167 = vmatprep.subr.mxu0 %v1110_v62 }
 0x2dd   : > { %1168 = vmatpush1.msra.mxu0 %v1109_v7 }
 0x2de   : > { %1169 = vmatprep.subr.mxu0 %v1108_v24 }
 0x2df   : > { %1170 = vmatpush1.msra.mxu0 %v1107_v49 }
 0x2e0   : > { %1204 = vmatmul.mubr.f32.vlgmr.msra.gmra.mxu0 %v2101_v5 }
 0x3a0   : > { %v1205_v11 = vpop.f32.mrf.mxu0 }
 0x3a1   : > { %v1206_v60 = vadd.f32 %v1205_v11, %v2235_v54 }
 0x3a2   : > { %v1207_v59 = vpop.f32.mrf.mxu0 }
 0x3a3   : > { %v1208_v61 = vadd.f32 %v1207_v59, %v2235_v54 }
 0x3a5   : > { %v1212_v0 = vcombine.low %v1206_v60, %v1208_v61 }
 0x3a7   : > { %1400 = vst.sshfl [vmem:[%s2239_s25 + $0x4] sm:$0x33 pattern:$0x76325410] %v1212_v0 }
 0x3a8   : > { %1591 = shalt.err (!%p1588_p3)
}
 0x3a9   : > { %s1592_s13 = scalar_lea.hbm %s1235_s8, 128  ;;  %s1596_s16 = scalar_lea.hbm %s2361_s5, 256 }
 0x3aa   : > { %p1593_p4 = scmp.ne.s32.totalorder %s1235_s8, %s1592_s13  ;;  %p1597_p9 = scmp.lt.s32.totalorder %s1235_s8, %s2361_s5 }
 0x3ab   : > { %p1598_p10 = scmp.lt.s32.totalorder %s1596_s16, %s1592_s13 }
 0x3ac   : > { %p1594_p7 = pnand %p1593_p4, %p1711_p5 }
 0x3ad   : > { %p1599_p11 = por %p1598_p10, %p1597_p9 }
 0x3ae   : > { %p1595_p8 = pneg %p1594_p7 }
 0x3b0   : > { %p1600_p12 = pnand %p1599_p11, %p1595_p8 }
 0x3b2   : > { %1603 = shalt.err (!%p1600_p12)
}
 0x3b3   : > { %1535 = dma.vmem_to_hbm [thread:$0]  (%p1711_p5), %s1238_s30, 128, %s1235_s8, %s1223_s9  }
 0x3b4 PF: > { %p1541_p13 = scmp.ge.s32.totalorder %s1638_s21, 2  ;;  %s1249_s25 = sand.u32 1, %s1626_s18  }
 0x3b5   : > { %s1250_s26 = scalar_lea.sflag [#allocation3], %s1249_s25 }
 0x3b6   : > { %p1538_p0 = pnand %p1541_p13, %p1715_p6 }
 0x3b8   : > { %p1539_p1 = pneg %p1538_p0 }
 0x3ba   : > { %1621 = dma.done.wait (%p1539_p1), %s1250_s26, 128  }
 0x3bb   : > { %1623 = vsyncadd (%p1539_p1), %s1250_s26, 4294967168  ;;  %p15_p2 = scmp.ge.s32.totalorder %s1698_s24, 4   ;;  %s2376_s18 = smov %s1630_s19 }
 0x3bc   : > { %s2377_s19 = smov %s1634_s20  ;;  %s2378_s20 = smov %s1709_s27 }
 0x3bd   : > { %s2379_s21 = smov %s1698_s24  ;;  %17 = sbr.rel (!%p15_p2) target bundleno = 3 (0x3), region = 75 }
 0x3c2   :  { %1255 = vsyncpa [#allocation3], 1 }
 0x3c3   :  { %1257 = vsyncpa [#allocation3 + $0x1], 1 }

</bundles_post_ra>
